<compile_context>
chip_gen: v5e
topology: v5e:2x2
jax: 0.10.0
libtpu: 0.0.40
codegen_flags: <defaults>
</compile_context>

<pallas_src>
import jax
import jax.numpy as jnp
from jax import lax
from jax.experimental import pallas as pl
from jax.experimental.pallas import tpu as pltpu


def comatch_kernel(
    x_ref,       # (TILE_B, D_in_p)          bf16  flattened NCHW input tile
    wf_ref,      # (D_in_p, F_p)             bf16  backbone feature weight
    bf_ref,      # (1, F_p)                  f32   backbone feature bias
    wcat_ref,    # (F_p, CLS_p + F_p)        bf16  [classifier | mlp_proj[0]] weights
    bcat_ref,    # (1, CLS_p + F_p)          f32   [classifier | mlp_proj[0]] biases
    w2_ref,      # (F_p, PROJ_p)             bf16  mlp_proj[2] weight
    b2_ref,      # (1, PROJ_p)               f32   mlp_proj[2] bias
    logits_ref,  # (TILE_B, CLS_p)           f32   output: logits (padded)
    feat_ref,    # (TILE_B, PROJ_p)          f32   output: l2-normalized proj feat
):
    # feat = backbone(x, only_feat=True)  (synthetic backbone: Linear + ReLU)
    # TODO(synk): for real image inputs (large D_in) K-tile this matmul with an
    # f32 VMEM accumulator and an "arbitrary" K grid axis instead of holding
    # all of wf in VMEM.
    feat = jnp.dot(x_ref[...], wf_ref[...], preferred_element_type=jnp.float32)
    feat = jnp.maximum(feat + bf_ref[...], 0.0)
    feat_bf = feat.astype(jnp.bfloat16)

    # Fused MXU call: [classifier(only_fc) | mlp_proj[0]] share LHS `feat`.
    z = jnp.dot(feat_bf, wcat_ref[...], preferred_element_type=jnp.float32)
    z = z + bcat_ref[...]
    cls_p = logits_ref.shape[1]
    logits_ref[...] = z[:, :cls_p]                       # classifier logits
    h = jnp.maximum(z[:, cls_p:], 0.0).astype(jnp.bfloat16)   # mlp_proj ReLU

    # mlp_proj[2]: Linear(F, proj_size)
    p = jnp.dot(h, w2_ref[...], preferred_element_type=jnp.float32) + b2_ref[...]

    # l2norm over dim 1: rsqrt + multiply (no eps, faithful to the reference).
    inv = lax.rsqrt(jnp.sum(p * p, axis=1, keepdims=True))
    feat_ref[...] = p * inv


def _round_up(n, m):
    return ((n + m - 1) // m) * m


def _pad2d(a, rows, cols):
    return jnp.pad(a, ((0, rows - a.shape[0]), (0, cols - a.shape[1])))


def comatch_forward(x_nchw, params):
    """x_nchw: (B, C, H, W) float32. Returns {'logits': (B, num_classes),
    'feat': (B, proj_size)} matching CoMatch_Net.forward semantics."""
    wf, bf, wc, bc, w1, b1, w2, b2 = params

    B = x_nchw.shape[0]
    x_flat = x_nchw.reshape(B, -1)          # same flattening torch .view does
    d_in = x_flat.shape[1]
    num_feat = wf.shape[1]
    num_cls = wc.shape[1]
    proj = w2.shape[1]

    LANE = 128
    SUB = 16                                # bf16 sublane packing
    d_in_p = _round_up(d_in, LANE)
    f_p = _round_up(num_feat, LANE)
    cls_p = _round_up(num_cls, LANE)
    proj_p = _round_up(proj, LANE)
    tile_b = min(128, _round_up(B, SUB))
    b_p = _round_up(B, tile_b)

    # Lane/sublane zero-pad + bf16 cast of matmul operands (biases stay f32).
    x_p = _pad2d(x_flat, b_p, d_in_p).astype(jnp.bfloat16)
    wf_p = _pad2d(wf, d_in_p, f_p).astype(jnp.bfloat16)
    bf_p = _pad2d(bf, 1, f_p).astype(jnp.float32)
    wcat = jnp.concatenate(
        [_pad2d(wc, f_p, cls_p), _pad2d(w1, f_p, f_p)], axis=1
    ).astype(jnp.bfloat16)
    bcat = jnp.concatenate(
        [_pad2d(bc, 1, cls_p), _pad2d(b1, 1, f_p)], axis=1
    ).astype(jnp.float32)
    w2_p = _pad2d(w2, f_p, proj_p).astype(jnp.bfloat16)
    b2_p = _pad2d(b2, 1, proj_p).astype(jnp.float32)

    const = lambda i: (0, 0)                # weights stay VMEM-resident per tile
    logits_p, feat_p = pl.pallas_call(
        comatch_kernel,
        out_shape=(
            jax.ShapeDtypeStruct((b_p, cls_p), jnp.float32),
            jax.ShapeDtypeStruct((b_p, proj_p), jnp.float32),
        ),
        grid=(b_p // tile_b,),
        in_specs=[
            pl.BlockSpec((tile_b, d_in_p), lambda i: (i, 0)),
            pl.BlockSpec((d_in_p, f_p), const),
            pl.BlockSpec((1, f_p), const),
            pl.BlockSpec((f_p, cls_p + f_p), const),
            pl.BlockSpec((1, cls_p + f_p), const),
            pl.BlockSpec((f_p, proj_p), const),
            pl.BlockSpec((1, proj_p), const),
        ],
        out_specs=(
            pl.BlockSpec((tile_b, cls_p), lambda i: (i, 0)),
            pl.BlockSpec((tile_b, proj_p), lambda i: (i, 0)),
        ),
        compiler_params=pltpu.CompilerParams(
            dimension_semantics=("parallel",)
        ),
    )(x_p, wf_p, bf_p, wcat, bcat, w2_p, b2_p)

    # Strip batch / lane padding.
    return {"logits": logits_p[:B, :num_cls], "feat": feat_p[:B, :proj]}


def init_params(key, d_in, num_features, num_classes, proj_size):
    """Deterministic synthetic parameter init (shapes per CoMatch_Net.__init__)."""
    ks = jax.random.split(key, 8)
    s = 0.05
    wf = s * jax.random.normal(ks[0], (d_in, num_features), jnp.float32)
    bf = s * jax.random.normal(ks[1], (1, num_features), jnp.float32)
    wc = s * jax.random.normal(ks[2], (num_features, num_classes), jnp.float32)
    bc = s * jax.random.normal(ks[3], (1, num_classes), jnp.float32)
    # mlp_proj = Linear(F, F) -> ReLU -> Linear(F, proj_size)
    w1 = s * jax.random.normal(ks[4], (num_features, num_features), jnp.float32)
    b1 = s * jax.random.normal(ks[5], (1, num_features), jnp.float32)
    w2 = s * jax.random.normal(ks[6], (num_features, proj_size), jnp.float32)
    b2 = s * jax.random.normal(ks[7], (1, proj_size), jnp.float32)
    return (wf, bf, wc, bc, w1, b1, w2, b2)


if __name__ == "__main__":
    # Small shapes consistent with the module: NCHW image input, num_features=32,
    # proj_size=128 (module default), num_classes=10.
    B, C, H, W = 2, 4, 16, 16
    NUM_FEATURES = 32
    NUM_CLASSES = 10
    PROJ_SIZE = 128

    key = jax.random.PRNGKey(0)
    k_x, k_p = jax.random.split(key)
    x = jax.random.normal(k_x, (B, C, H, W), jnp.float32)
    params = init_params(k_p, C * H * W, NUM_FEATURES, NUM_CLASSES, PROJ_SIZE)

    out = comatch_forward(x, params)
    jax.block_until_ready(out)

    assert out["logits"].shape == (B, NUM_CLASSES)
    assert out["feat"].shape == (B, PROJ_SIZE)
    # feat must be L2-normalized along dim 1
    norms = jnp.sqrt(jnp.sum(out["feat"].astype(jnp.float32) ** 2, axis=1))
    assert jnp.allclose(norms, 1.0, atol=1e-4)
    print("KERNEL_OK")
</pallas_src>

<mosaic_0001>
module attributes {stable_mosaic.version = 11 : i64} {
  func.func @comatch_kernel(%arg0: i32, %arg1: memref<16x1024xbf16, #tpu.memory_space<vmem>>, %arg2: memref<1024x128xbf16, #tpu.memory_space<vmem>>, %arg3: memref<1x128xf32, #tpu.memory_space<vmem>>, %arg4: memref<128x256xbf16, #tpu.memory_space<vmem>>, %arg5: memref<1x256xf32, #tpu.memory_space<vmem>>, %arg6: memref<128x128xbf16, #tpu.memory_space<vmem>>, %arg7: memref<1x128xf32, #tpu.memory_space<vmem>>, %arg8: memref<16x128xf32, #tpu.memory_space<vmem>>, %arg9: memref<16x128xf32, #tpu.memory_space<vmem>>) attributes {dimension_semantics = [#tpu.dimension_semantics<parallel>], iteration_bounds = array<i64: 1>, scalar_prefetch = 0 : i64, scratch_operands = 0 : i64, tpu.core_type = #tpu.core_type<tc>, window_params = [{transform_indices = @transform_0, window_bounds = array<i64: 16, 1024>}, {pipeline_mode = #tpu.pipeline_mode<synchronous>, transform_indices = @transform_1, window_bounds = array<i64: 1024, 128>}, {pipeline_mode = #tpu.pipeline_mode<synchronous>, transform_indices = @transform_2, window_bounds = array<i64: 1, 128>}, {pipeline_mode = #tpu.pipeline_mode<synchronous>, transform_indices = @transform_3, window_bounds = array<i64: 128, 256>}, {pipeline_mode = #tpu.pipeline_mode<synchronous>, transform_indices = @transform_4, window_bounds = array<i64: 1, 256>}, {pipeline_mode = #tpu.pipeline_mode<synchronous>, transform_indices = @transform_5, window_bounds = array<i64: 128, 128>}, {pipeline_mode = #tpu.pipeline_mode<synchronous>, transform_indices = @transform_6, window_bounds = array<i64: 1, 128>}, {transform_indices = @transform_7, window_bounds = array<i64: 16, 128>}, {transform_indices = @transform_8, window_bounds = array<i64: 16, 128>}]} {
    %c0 = arith.constant 0 : index
    %c0_0 = arith.constant 0 : index
    %0 = vector.load %arg1[%c0, %c0_0] : memref<16x1024xbf16, #tpu.memory_space<vmem>>, vector<16x1024xbf16>
    %c0_1 = arith.constant 0 : index
    %c0_2 = arith.constant 0 : index
    %1 = vector.load %arg2[%c0_1, %c0_2] : memref<1024x128xbf16, #tpu.memory_space<vmem>>, vector<1024x128xbf16>
    %cst = arith.constant dense<0.000000e+00> : vector<16x128xf32>
    %2 = tpu.matmul %0, %1, %cst {dimension_numbers = #tpu.dot_dimension_numbers<[1], [0], [0], [1], [0, 0, 1, 1], [], []>} : vector<16x1024xbf16>, vector<1024x128xbf16>, vector<16x128xf32> -> vector<16x128xf32>
    %c0_3 = arith.constant 0 : index
    %c0_4 = arith.constant 0 : index
    %3 = vector.load %arg3[%c0_3, %c0_4] : memref<1x128xf32, #tpu.memory_space<vmem>>, vector<1x128xf32>
    %4 = vector.broadcast %3 : vector<1x128xf32> to vector<16x128xf32>
    %5 = arith.addf %2, %4 : vector<16x128xf32>
    %cst_5 = arith.constant 0.000000e+00 : f32
    %6 = vector.broadcast %cst_5 : f32 to vector<16x128xf32>
    %7 = arith.maximumf %5, %6 : vector<16x128xf32>
    %8 = arith.truncf %7 : vector<16x128xf32> to vector<16x128xbf16>
    %c0_6 = arith.constant 0 : index
    %c0_7 = arith.constant 0 : index
    %9 = vector.load %arg4[%c0_6, %c0_7] : memref<128x256xbf16, #tpu.memory_space<vmem>>, vector<128x256xbf16>
    %cst_8 = arith.constant dense<0.000000e+00> : vector<16x256xf32>
    %10 = tpu.matmul %8, %9, %cst_8 {dimension_numbers = #tpu.dot_dimension_numbers<[1], [0], [0], [1], [0, 0, 1, 1], [], []>} : vector<16x128xbf16>, vector<128x256xbf16>, vector<16x256xf32> -> vector<16x256xf32>
    %c0_9 = arith.constant 0 : index
    %c0_10 = arith.constant 0 : index
    %11 = vector.load %arg5[%c0_9, %c0_10] : memref<1x256xf32, #tpu.memory_space<vmem>>, vector<1x256xf32>
    %12 = vector.broadcast %11 : vector<1x256xf32> to vector<16x256xf32>
    %13 = arith.addf %10, %12 : vector<16x256xf32>
    %14 = vector.extract_strided_slice %13 {offsets = [0, 0], sizes = [16, 128], strides = [1, 1]} : vector<16x256xf32> to vector<16x128xf32>
    %c0_11 = arith.constant 0 : index
    %c0_12 = arith.constant 0 : index
    %15 = vector.load %arg8[%c0_11, %c0_12] : memref<16x128xf32, #tpu.memory_space<vmem>>, vector<16x128xf32>
    tpu.vector_store %arg8[%c0_11, %c0_12], %14 {strides = array<i32>} : memref<16x128xf32, #tpu.memory_space<vmem>>, vector<16x128xf32>,
    %16 = vector.extract_strided_slice %13 {offsets = [0, 128], sizes = [16, 128], strides = [1, 1]} : vector<16x256xf32> to vector<16x128xf32>
    %cst_13 = arith.constant 0.000000e+00 : f32
    %17 = vector.broadcast %cst_13 : f32 to vector<16x128xf32>
    %18 = arith.maximumf %16, %17 : vector<16x128xf32>
    %19 = arith.truncf %18 : vector<16x128xf32> to vector<16x128xbf16>
    %c0_14 = arith.constant 0 : index
    %c0_15 = arith.constant 0 : index
    %20 = vector.load %arg6[%c0_14, %c0_15] : memref<128x128xbf16, #tpu.memory_space<vmem>>, vector<128x128xbf16>
    %cst_16 = arith.constant dense<0.000000e+00> : vector<16x128xf32>
    %21 = tpu.matmul %19, %20, %cst_16 {dimension_numbers = #tpu.dot_dimension_numbers<[1], [0], [0], [1], [0, 0, 1, 1], [], []>} : vector<16x128xbf16>, vector<128x128xbf16>, vector<16x128xf32> -> vector<16x128xf32>
    %c0_17 = arith.constant 0 : index
    %c0_18 = arith.constant 0 : index
    %22 = vector.load %arg7[%c0_17, %c0_18] : memref<1x128xf32, #tpu.memory_space<vmem>>, vector<1x128xf32>
    %23 = vector.broadcast %22 : vector<1x128xf32> to vector<16x128xf32>
    %24 = arith.addf %21, %23 : vector<16x128xf32>
    %25 = arith.mulf %24, %24 : vector<16x128xf32>
    %cst_19 = arith.constant dense<0.000000e+00> : vector<16xf32>
    %26 = vector.multi_reduction <add>, %25, %cst_19 [1] : vector<16x128xf32> to vector<16xf32>
    %27 = vector.shape_cast %26 : vector<16xf32> to vector<16x1xf32>
    %28 = math.rsqrt %27 : vector<16x1xf32>
    %29 = vector.broadcast %28 : vector<16x1xf32> to vector<16x128xf32>
    %30 = arith.mulf %24, %29 : vector<16x128xf32>
    %c0_20 = arith.constant 0 : index
    %c0_21 = arith.constant 0 : index
    %31 = vector.load %arg9[%c0_20, %c0_21] : memref<16x128xf32, #tpu.memory_space<vmem>>, vector<16x128xf32>
    tpu.vector_store %arg9[%c0_20, %c0_21], %30 {strides = array<i32>} : memref<16x128xf32, #tpu.memory_space<vmem>>, vector<16x128xf32>,
    return
  }
  func.func @transform_0(%arg0: i32) -> (i32, i32) {
    %c0_i32 = arith.constant 0 : i32
    %c0_i32_0 = arith.constant 0 : i32
    return %arg0, %c0_i32 : i32, i32
  }
  func.func @transform_1(%arg0: i32) -> (i32, i32) {
    %c0_i32 = arith.constant 0 : i32
    %c0_i32_0 = arith.constant 0 : i32
    %c0_i32_1 = arith.constant 0 : i32
    return %c0_i32, %c0_i32_0 : i32, i32
  }
  func.func @transform_2(%arg0: i32) -> (i32, i32) {
    %c0_i32 = arith.constant 0 : i32
    %c0_i32_0 = arith.constant 0 : i32
    %c0_i32_1 = arith.constant 0 : i32
    return %c0_i32, %c0_i32_0 : i32, i32
  }
  func.func @transform_3(%arg0: i32) -> (i32, i32) {
    %c0_i32 = arith.constant 0 : i32
    %c0_i32_0 = arith.constant 0 : i32
    %c0_i32_1 = arith.constant 0 : i32
    return %c0_i32, %c0_i32_0 : i32, i32
  }
  func.func @transform_4(%arg0: i32) -> (i32, i32) {
    %c0_i32 = arith.constant 0 : i32
    %c0_i32_0 = arith.constant 0 : i32
    %c0_i32_1 = arith.constant 0 : i32
    return %c0_i32, %c0_i32_0 : i32, i32
  }
  func.func @transform_5(%arg0: i32) -> (i32, i32) {
    %c0_i32 = arith.constant 0 : i32
    %c0_i32_0 = arith.constant 0 : i32
    %c0_i32_1 = arith.constant 0 : i32
    return %c0_i32, %c0_i32_0 : i32, i32
  }
  func.func @transform_6(%arg0: i32) -> (i32, i32) {
    %c0_i32 = arith.constant 0 : i32
    %c0_i32_0 = arith.constant 0 : i32
    %c0_i32_1 = arith.constant 0 : i32
    return %c0_i32, %c0_i32_0 : i32, i32
  }
  func.func @transform_7(%arg0: i32) -> (i32, i32) {
    %c0_i32 = arith.constant 0 : i32
    %c0_i32_0 = arith.constant 0 : i32
    return %arg0, %c0_i32 : i32, i32
  }
  func.func @transform_8(%arg0: i32) -> (i32, i32) {
    %c0_i32 = arith.constant 0 : i32
    %c0_i32_0 = arith.constant 0 : i32
    return %arg0, %c0_i32 : i32, i32
  }
}

</mosaic_0001>

<bundles_post_ra>
// kernel: tpu_custom_call.1
= control target key start
LH: loop header
LB: loop body
LE: loop exit
PB: predicated region body
PF: predicated region fallthrough
CT: control target
= control target key end

     0   :  { %14 = vsyncpa [#allocation3], 0  ;;  %s1803_s0 = inlined_call_operand.hbm [shape: bf16[16,1024], index: 0, kind: input, shape index: {}]   ;;  %s1804_s1 = inlined_call_operand.hbm [shape: bf16[1024,128], index: 1, kind: input, shape index: {}]   ;;  %s1805_s2 = inlined_call_operand.vmem [shape: f32[1,128], index: 2, kind: input, shape index: {}]   ;;  %s1806_s3 = inlined_call_operand.hbm [shape: bf16[128,256], index: 3, kind: input, shape index: {}]   ;;  %s1807_s4 = inlined_call_operand.vmem [shape: f32[1,256], index: 4, kind: input, shape index: {}]   ;;  %s1808_s5 = inlined_call_operand.hbm [shape: bf16[128,128], index: 5, kind: input, shape index: {}]   ;;  %s1809_s6 = inlined_call_operand.vmem [shape: f32[1,128], index: 6, kind: input, shape index: {}]   ;;  %s1810_s7 = inlined_call_operand.hbm [shape: f32[16,128], index: 7, kind: output, shape index: {0}]   ;;  %s1811_s8 = inlined_call_operand.hbm [shape: f32[16,128], index: 8, kind: output, shape index: {1}]  }
   0x1   :  { %15 = vsyncpa [#allocation6], 0 }
   0x2   :  { %16 = vsyncpa [#allocation9], 0 }
   0x3   :  { %17 = vsyncpa [#allocation4], 0  ;;  %s36_s29 = sshll.u32 %s1804_s1, 4  ;;  %s37_s29 = int_to_ptr.hbm [resolvable:$true] %s36_s29 }
   0x4   :  { %18 = vsyncpa [#allocation12], 0  ;;  %s1710_s30 = smov [#allocation5]   ;;  %s23_s12 = sshll.u32 %s1803_s0, 4  ;;  %s24_s12 = int_to_ptr.hbm [resolvable:$true] %s23_s12 }
   0x5   :  { %s38_s9 = sshll.u32 %s1710_s30, 4  ;;  %s1711_s13 = smov 64   ;;  %s39_s9 = int_to_ptr.vmem [resolvable:$true] %s38_s9 }
   0x6   :  { %s1712_s14 = smov 4   ;;  %s1713_s15 = smov [#allocation2]  }
   0x7   :  { %44 = dma.hbm_to_vmem [thread:$0]  %s37_s29, 8192, %s39_s9, [#allocation6], %s1711_s13, %s1711_s13, %s1712_s14  }
   0x8   :  { %s25_s16 = sshll.u32 %s1713_s15, 4  ;;  %s1714_s17 = smov 512   ;;  %s26_s16 = int_to_ptr.vmem [resolvable:$true] %s25_s16 }
   0x9   :  { %s1715_s18 = smov 32   ;;  %s51_s20 = sshll.u32 %s1806_s3, 4  ;;  %s52_s20 = int_to_ptr.hbm [resolvable:$true] %s51_s20 }
   0xa   :  { %31 = dma.hbm_to_vmem [thread:$0]  %s24_s12, 1024, %s26_s16, [#allocation3], %s1714_s17, %s1714_s17, %s1715_s18  }
   0xb   :  { %s1716_s21 = smov [#allocation7]   ;;  %s66_s24 = sshll.u32 %s1808_s5, 4  ;;  %s67_s24 = int_to_ptr.hbm [resolvable:$true] %s66_s24 }
   0xc   :  { %s53_s22 = sshll.u32 %s1716_s21, 4  ;;  %s1717_s25 = smov 128   ;;  %s54_s22 = int_to_ptr.vmem [resolvable:$true] %s53_s22 }
   0xd   :  { %s1718_s26 = smov 8   ;;  %s1719_s27 = smov [#allocation8]  }
   0xe   :  { %59 = dma.hbm_to_vmem [thread:$0]  %s52_s20, 2048, %s54_s22, [#allocation6], %s1717_s25, %s1717_s25, %s1718_s26  }
   0xf   :  { %s68_s28 = sshll.u32 %s1719_s27, 4  ;;  %s69_s28 = int_to_ptr.vmem [resolvable:$true] %s68_s28 }
  0x10   :  { %74 = dma.hbm_to_vmem [thread:$0]  %s67_s24, 1024, %s69_s28, [#allocation9], %s1711_s13, %s1711_s13, %s1712_s14  }
  0x11   :  { %1700 = dma.done.wait [#allocation3], 1024  }
  0x12   :  { %1701 = vsyncadd [#allocation3], 4294966272 }
  0x13   :  { %1702 = dma.done.wait [#allocation6], 10240  }
  0x14   :  { %1703 = vsyncadd [#allocation6], 4294957056 }
  0x15   :  { %1704 = dma.done.wait [#allocation9], 1024  }
  0x16   :  { %1705 = vsyncadd [#allocation9], 4294966272  ;;  %v1457_v0 = vld [vmem:[#allocation5 + $0x38] sm:$0xff]  ;;  %v1456_v4 = vld [vmem:[#allocation5 + $0x30] sm:$0xff]  ;;  %s1025_s13 = sshll.u32 %s1810_s7, 4  ;;  %s1038_s16 = sshll.u32 %s1811_s8, 4  ;;  %s1026_s13 = int_to_ptr.hbm [resolvable:$true] %s1025_s13  ;;  %s1039_s16 = int_to_ptr.hbm [resolvable:$true] %s1038_s16 }
  0x17   :  { %v1465_v1 = vld [vmem:[#allocation5 + $0x78] sm:$0xff]  ;;  %657 = vmatpush.bf16.msra.mxu0 %v1457_v0  ;;  %v1464_v5 = vld [vmem:[#allocation5 + $0x70] sm:$0xff]  ;;  %v1455_v8 = vld [vmem:[#allocation5 + $0x28] sm:$0xff] }
  0x18   :  { %v1473_v2 = vld [vmem:[#allocation5 + $0xb8] sm:$0xff]  ;;  %671 = vmatpush.bf16.msra.mxu1 %v1465_v1  ;;  %v1472_v6 = vld [vmem:[#allocation5 + $0xb0] sm:$0xff]  ;;  %v1463_v9 = vld [vmem:[#allocation5 + $0x68] sm:$0xff] }
  0x19   :  { %v1481_v3 = vld [vmem:[#allocation5 + $0xf8] sm:$0xff]  ;;  %685 = vmatpush.bf16.msra.mxu2 %v1473_v2  ;;  %v1480_v7 = vld [vmem:[#allocation5 + $0xf0] sm:$0xff]  ;;  %v1471_v10 = vld [vmem:[#allocation5 + $0xa8] sm:$0xff] }
  0x1a   :  { %699 = vmatpush.bf16.msra.mxu3 %v1481_v3  ;;  %v1479_v11 = vld [vmem:[#allocation5 + $0xe8] sm:$0xff]  ;;  %v1454_v12 = vld [vmem:[#allocation5 + $0x20] sm:$0xff]  ;;  %v1453_v16 = vld [vmem:[#allocation5 + $0x18] sm:$0xff] }
  0x1b   :  { %658 = vmatpush.bf16.msra.mxu0 %v1456_v4  ;;  %v1462_v13 = vld [vmem:[#allocation5 + $0x60] sm:$0xff]  ;;  %v1461_v17 = vld [vmem:[#allocation5 + $0x58] sm:$0xff]  ;;  %v1452_v20 = vld [vmem:[#allocation5 + $0x10] sm:$0xff] }
  0x1c   :  { %672 = vmatpush.bf16.msra.mxu1 %v1464_v5  ;;  %v1470_v14 = vld [vmem:[#allocation5 + $0xa0] sm:$0xff]  ;;  %v1469_v18 = vld [vmem:[#allocation5 + $0x98] sm:$0xff]  ;;  %v1460_v21 = vld [vmem:[#allocation5 + $0x50] sm:$0xff] }
  0x1d   :  { %686 = vmatpush.bf16.msra.mxu2 %v1472_v6  ;;  %v1478_v15 = vld [vmem:[#allocation5 + $0xe0] sm:$0xff]  ;;  %v1477_v19 = vld [vmem:[#allocation5 + $0xd8] sm:$0xff]  ;;  %v1468_v22 = vld [vmem:[#allocation5 + $0x90] sm:$0xff] }
  0x1e   :  { %700 = vmatpush.bf16.msra.mxu3 %v1480_v7  ;;  %v1476_v23 = vld [vmem:[#allocation5 + $0xd0] sm:$0xff]  ;;  %v1451_v24 = vld [vmem:[#allocation5 + $0x8] sm:$0xff]  ;;  %v1450_v28 = vld [vmem:[#allocation5] sm:$0xff] }
  0x1f   :  { %659 = vmatpush.bf16.msra.mxu0 %v1455_v8  ;;  %v1459_v25 = vld [vmem:[#allocation5 + $0x48] sm:$0xff]  ;;  %v1458_v29 = vld [vmem:[#allocation5 + $0x40] sm:$0xff]  ;;  %v1489_v32 = vld [vmem:[#allocation5 + $0x138] sm:$0xff] }
  0x20   :  { %673 = vmatpush.bf16.msra.mxu1 %v1463_v9  ;;  %v1467_v26 = vld [vmem:[#allocation5 + $0x88] sm:$0xff]  ;;  %v1466_v30 = vld [vmem:[#allocation5 + $0x80] sm:$0xff]  ;;  %v1497_v33 = vld [vmem:[#allocation5 + $0x178] sm:$0xff] }
  0x21   :  { %687 = vmatpush.bf16.msra.mxu2 %v1471_v10  ;;  %v1475_v27 = vld [vmem:[#allocation5 + $0xc8] sm:$0xff]  ;;  %v1474_v31 = vld [vmem:[#allocation5 + $0xc0] sm:$0xff]  ;;  %v1505_v42 = vld [vmem:[#allocation5 + $0x1b8] sm:$0xff] }
  0x22   :  { %701 = vmatpush.bf16.msra.mxu3 %v1479_v11  ;;  %v1068_v34 = vld [vmem:[#allocation2 + $0x8] sm:$0xf]  ;;  %v1060_v36 = vld [vmem:[#allocation2] sm:$0xf]  ;;  %v1443_v38 = vld [vmem:[#allocation2 + $0xc] sm:$0xf] }
  0x23   :  { %660 = vmatpush.bf16.msra.mxu0 %v1454_v12  ;;  %v1447_v35 = vld [vmem:[#allocation2 + $0x24] sm:$0xf0]  ;;  %v1446_v37 = vld [vmem:[#allocation2 + $0x1c] sm:$0xf0]  ;;  %v1070_v39 = vld [vmem:[#allocation2 + $0x28] sm:$0xf0] }
  0x24   :  { %674 = vmatpush.bf16.msra.mxu1 %v1462_v13  ;;  %v1442_v40 = vld [vmem:[#allocation2 + $0x4] sm:$0xf]  ;;  %v1513_v43 = vld [vmem:[#allocation5 + $0x1f8] sm:$0xff]  ;;  %v1069_v44 = vor.u32 %v1447_v35, %v1068_v34  ;;  %v1061_v45 = vor.u32 %v1446_v37, %v1060_v36  ;;  %v1073_v46 = vor.u32 %v1443_v38, %v1070_v39  ;;  %v1488_v48 = vld [vmem:[#allocation5 + $0x130] sm:$0xff] }
  0x25   :  { %688 = vmatpush.bf16.msra.mxu2 %v1470_v14  ;;  %v1062_v41 = vld [vmem:[#allocation2 + $0x20] sm:$0xf0]  ;;  %v1496_v49 = vld [vmem:[#allocation5 + $0x170] sm:$0xff]  ;;  %v1487_v52 = vld [vmem:[#allocation5 + $0x128] sm:$0xff] }
  0x26   :  { %702 = vmatpush.bf16.msra.mxu3 %v1478_v15  ;;  %v1065_v47 = vor.u32 %v1442_v40, %v1062_v41  ;;  %v1504_v50 = vld [vmem:[#allocation5 + $0x1b0] sm:$0xff]  ;;  %v1495_v53 = vld [vmem:[#allocation5 + $0x168] sm:$0xff]  ;;  %v1486_v56 = vld [vmem:[#allocation5 + $0x120] sm:$0xff] }
  0x27   :  { %661 = vmatpush.bf16.msra.mxu0 %v1453_v16  ;;  %v1512_v51 = vld [vmem:[#allocation5 + $0x1f0] sm:$0xff]  ;;  %v1503_v54 = vld [vmem:[#allocation5 + $0x1a8] sm:$0xff]  ;;  %v1494_v57 = vld [vmem:[#allocation5 + $0x160] sm:$0xff] }
  0x28   :  { %675 = vmatpush.bf16.msra.mxu1 %v1461_v17  ;;  %v1511_v55 = vld [vmem:[#allocation5 + $0x1e8] sm:$0xff]  ;;  %v1502_v58 = vld [vmem:[#allocation5 + $0x1a0] sm:$0xff]  ;;  %v1485_v60 = vld [vmem:[#allocation5 + $0x118] sm:$0xff] }
  0x29   :  { %689 = vmatpush.bf16.msra.mxu2 %v1469_v18  ;;  %v1510_v59 = vld [vmem:[#allocation5 + $0x1e0] sm:$0xff]  ;;  %v1493_v61 = vld [vmem:[#allocation5 + $0x158] sm:$0xff]  ;;  %v1484_v0 = vld [vmem:[#allocation5 + $0x110] sm:$0xff] }
  0x2a   :  { %703 = vmatpush.bf16.msra.mxu3 %v1477_v19  ;;  %v1501_v62 = vld [vmem:[#allocation5 + $0x198] sm:$0xff]  ;;  %v1492_v1 = vld [vmem:[#allocation5 + $0x150] sm:$0xff]  ;;  %v1483_v4 = vld [vmem:[#allocation5 + $0x108] sm:$0xff] }
  0x2b   :  { %662 = vmatpush.bf16.msra.mxu0 %v1452_v20  ;;  %v1509_v63 = vld [vmem:[#allocation5 + $0x1d8] sm:$0xff]  ;;  %v1500_v2 = vld [vmem:[#allocation5 + $0x190] sm:$0xff]  ;;  %v1491_v5 = vld [vmem:[#allocation5 + $0x148] sm:$0xff] }
  0x2c   :  { %676 = vmatpush.bf16.msra.mxu1 %v1460_v21  ;;  %v1508_v3 = vld [vmem:[#allocation5 + $0x1d0] sm:$0xff]  ;;  %v1499_v6 = vld [vmem:[#allocation5 + $0x188] sm:$0xff]  ;;  %v1482_v8 = vld [vmem:[#allocation5 + $0x100] sm:$0xff] }
  0x2d   :  { %690 = vmatpush.bf16.msra.mxu2 %v1468_v22  ;;  %v1507_v7 = vld [vmem:[#allocation5 + $0x1c8] sm:$0xff]  ;;  %v1490_v9 = vld [vmem:[#allocation5 + $0x140] sm:$0xff]  ;;  %v1076_v12 = vld [vmem:[#allocation2 + $0x10] sm:$0xf] }
  0x2e   :  { %704 = vmatpush.bf16.msra.mxu3 %v1476_v23  ;;  %v1498_v10 = vld [vmem:[#allocation5 + $0x180] sm:$0xff]  ;;  %v1448_v13 = vld [vmem:[#allocation2 + $0x2c] sm:$0xf0]  ;;  %v1444_v14 = vld [vmem:[#allocation2 + $0x14] sm:$0xf] }
  0x2f   :  { %663 = vmatpush.bf16.msra.mxu0 %v1451_v24  ;;  %v1506_v11 = vld [vmem:[#allocation5 + $0x1c0] sm:$0xff]  ;;  %v1078_v15 = vld [vmem:[#allocation2 + $0x30] sm:$0xf0]  ;;  %v1084_v16 = vld [vmem:[#allocation2 + $0x18] sm:$0xf]  ;;  %v1077_v20 = vor.u32 %v1448_v13, %v1076_v12 }
  0x30   :  { %677 = vmatpush.bf16.msra.mxu1 %v1459_v25  ;;  %v1449_v17 = vld [vmem:[#allocation2 + $0x34] sm:$0xf0]  ;;  %v1445_v18 = vld [vmem:[#allocation2 + $0x1c] sm:$0xf]  ;;  %v1081_v21 = vor.u32 %v1444_v14, %v1078_v15  ;;  %v1404_v24 = vld [vmem:[#allocation7 + $0x70] sm:$0xf] }
  0x31   :  { %691 = vmatpush.bf16.msra.mxu2 %v1467_v26  ;;  %v1086_v19 = vld [vmem:[#allocation2 + $0x38] sm:$0xf0]  ;;  %v1085_v22 = vor.u32 %v1449_v17, %v1084_v16  ;;  %v1529_v25 = vld [vmem:[#allocation7 + $0x74] sm:$0xf0]  ;;  %v1528_v26 = vld [vmem:[#allocation7 + $0x74] sm:$0xf] }
  0x32   :  { %705 = vmatpush.bf16.msra.mxu3 %v1475_v27  ;;  %v1089_v23 = vor.u32 %v1445_v18, %v1086_v19  ;;  %v1405_v27 = vor.u32 %v1529_v25, %v1404_v24  ;;  %v1388_v36 = vld [vmem:[#allocation7 + $0x50] sm:$0xf]  ;;  %v1525_v37 = vld [vmem:[#allocation7 + $0x54] sm:$0xf0]  ;;  %v1524_v38 = vld [vmem:[#allocation7 + $0x54] sm:$0xf] }
  0x33   :  { %664 = vmatpush.bf16.msra.mxu0 %v1450_v28  ;;  %v1406_v28 = vld [vmem:[#allocation7 + $0x78] sm:$0xf0]  ;;  %v1389_v39 = vor.u32 %v1525_v37, %v1388_v36  ;;  %v1536_v16 = vld [vmem:[#allocation8 + $0x30] sm:$0xff] }
  0x34   :  { %678 = vmatpush.bf16.msra.mxu1 %v1458_v29  ;;  %v1396_v29 = vld [vmem:[#allocation7 + $0x60] sm:$0xf]  ;;  %v1390_v40 = vld [vmem:[#allocation7 + $0x58] sm:$0xf0] }
  0x35   :  { %692 = vmatpush.bf16.msra.mxu2 %v1466_v30  ;;  %v1527_v30 = vld [vmem:[#allocation7 + $0x64] sm:$0xf0]  ;;  %v1393_v41 = vor.u32 %v1524_v38, %v1390_v40  ;;  %v1537_v15 = vld [vmem:[#allocation8 + $0x38] sm:$0xff] }
  0x36   :  { %706 = vmatpush.bf16.msra.mxu3 %v1474_v31  ;;  %665 = vmatmul.bf16.vlgmr.msra.gmra.mxu0 %v1061_v45  ;;  %v1409_v31 = vor.u32 %v1528_v26, %v1406_v28  ;;  %v1397_v34 = vor.u32 %v1527_v30, %v1396_v29  ;;  %v1534_v26 = vld [vmem:[#allocation8 + $0x20] sm:$0xff] }
  0x37   :  { %713 = vmatpush.bf16.msrb.mxu0 %v1489_v32  ;;  %679 = vmatmul.bf16.vlgmr.msra.gmra.mxu1 %v1065_v47  ;;  %v1526_v32 = vld [vmem:[#allocation7 + $0x64] sm:$0xf] }
  0x38   :  { %727 = vmatpush.bf16.msrb.mxu1 %v1497_v33  ;;  %693 = vmatmul.bf16.vlgmr.msra.gmra.mxu2 %v1069_v44  ;;  %v1398_v33 = vld [vmem:[#allocation7 + $0x68] sm:$0xf0]  ;;  %v1522_v44 = vld [vmem:[#allocation7 + $0x44] sm:$0xf] }
  0x39   :  { %741 = vmatpush.bf16.msrb.mxu2 %v1505_v42  ;;  %707 = vmatmul.bf16.vlgmr.msra.gmra.mxu3 %v1073_v46  ;;  %v1401_v35 = vor.u32 %v1526_v32, %v1398_v33  ;;  %v1380_v42 = vld [vmem:[#allocation7 + $0x40] sm:$0xf]  ;;  %v1382_v46 = vld [vmem:[#allocation7 + $0x48] sm:$0xf0] }
  0x3a   :  { %755 = vmatpush.bf16.msrb.mxu3 %v1513_v43  ;;  %v1523_v43 = vld [vmem:[#allocation7 + $0x44] sm:$0xf0]  ;;  %v1385_v47 = vor.u32 %v1522_v44, %v1382_v46 }
  0x3b   :  { %714 = vmatpush.bf16.msrb.mxu0 %v1488_v48  ;;  %v1381_v45 = vor.u32 %v1523_v43, %v1380_v42  ;;  %v1372_v48 = vld [vmem:[#allocation7 + $0x30] sm:$0xf] }
  0x3c   :  { %728 = vmatpush.bf16.msrb.mxu1 %v1496_v49  ;;  %v1521_v49 = vld [vmem:[#allocation7 + $0x34] sm:$0xf0] }
  0x3d   :  { %742 = vmatpush.bf16.msrb.mxu2 %v1504_v50  ;;  %v1520_v50 = vld [vmem:[#allocation7 + $0x34] sm:$0xf] }
  0x3e   :  { %756 = vmatpush.bf16.msrb.mxu3 %v1512_v51  ;;  %v1373_v51 = vor.u32 %v1521_v49, %v1372_v48  ;;  %v1533_v48 = vld [vmem:[#allocation8 + $0x18] sm:$0xff]  ;;  %v1532_v49 = vld [vmem:[#allocation8 + $0x10] sm:$0xff] }
  0x3f   :  { %715 = vmatpush.bf16.msrb.mxu0 %v1487_v52  ;;  %v1374_v52 = vld [vmem:[#allocation7 + $0x38] sm:$0xf0] }
  0x40   :  { %729 = vmatpush.bf16.msrb.mxu1 %v1495_v53  ;;  %v1377_v53 = vor.u32 %v1520_v50, %v1374_v52  ;;  %v1531_v50 = vld [vmem:[#allocation8 + $0x8] sm:$0xff]  ;;  %v788_v52 = vld [vmem:[%s1807_s4] sm:$0x3]  ;;  %s1720_s4 = smov [#allocation10]  }
  0x41   :  { %743 = vmatpush.bf16.msrb.mxu2 %v1503_v54  ;;  %v1364_v54 = vld [vmem:[#allocation7 + $0x20] sm:$0xf]  ;;  %s1023_s10 = sshll.u32 %s1720_s4, 4  ;;  %s1024_s10 = int_to_ptr.vmem [resolvable:$true] %s1023_s10 }
  0x42   :  { %757 = vmatpush.bf16.msrb.mxu3 %v1511_v55  ;;  %v1519_v55 = vld [vmem:[#allocation7 + $0x24] sm:$0xf0] }
  0x43   :  { %716 = vmatpush.bf16.msrb.mxu0 %v1486_v56  ;;  %v1518_v56 = vld [vmem:[#allocation7 + $0x24] sm:$0xf] }
  0x44   :  { %730 = vmatpush.bf16.msrb.mxu1 %v1494_v57  ;;  %v1365_v57 = vor.u32 %v1519_v55, %v1364_v54 }
  0x45   :  { %744 = vmatpush.bf16.msrb.mxu2 %v1502_v58  ;;  %v1366_v58 = vld [vmem:[#allocation7 + $0x28] sm:$0xf0] }
  0x46   :  { %758 = vmatpush.bf16.msrb.mxu3 %v1510_v59  ;;  %v1369_v59 = vor.u32 %v1518_v56, %v1366_v58 }
  0x47   :  { %717 = vmatpush.bf16.msrb.mxu0 %v1485_v60 }
  0x48   :  { %731 = vmatpush.bf16.msrb.mxu1 %v1493_v61  ;;  %v1356_v61 = vld [vmem:[#allocation7 + $0x10] sm:$0xf] }
  0x49   :  { %745 = vmatpush.bf16.msrb.mxu2 %v1501_v62  ;;  %v1517_v62 = vld [vmem:[#allocation7 + $0x14] sm:$0xf0] }
  0x4a   :  { %759 = vmatpush.bf16.msrb.mxu3 %v1509_v63  ;;  %v1516_v63 = vld [vmem:[#allocation7 + $0x14] sm:$0xf] }
  0x4b   :  { %718 = vmatpush.bf16.msrb.mxu0 %v1484_v0  ;;  %v1357_v0 = vor.u32 %v1517_v62, %v1356_v61 }
  0x4c   :  { %732 = vmatpush.bf16.msrb.mxu1 %v1492_v1  ;;  %v1358_v1 = vld [vmem:[#allocation7 + $0x18] sm:$0xf0] }
  0x4d   :  { %746 = vmatpush.bf16.msrb.mxu2 %v1500_v2  ;;  %v1361_v2 = vor.u32 %v1516_v63, %v1358_v1 }
  0x4e   :  { %760 = vmatpush.bf16.msrb.mxu3 %v1508_v3 }
  0x4f   :  { %719 = vmatpush.bf16.msrb.mxu0 %v1483_v4  ;;  %v1348_v4 = vld [vmem:[#allocation7] sm:$0xf] }
  0x50   :  { %733 = vmatpush.bf16.msrb.mxu1 %v1491_v5  ;;  %v1515_v5 = vld [vmem:[#allocation7 + $0x4] sm:$0xf0] }
  0x51   :  { %747 = vmatpush.bf16.msrb.mxu2 %v1499_v6  ;;  %v1514_v6 = vld [vmem:[#allocation7 + $0x4] sm:$0xf] }
  0x52   :  { %761 = vmatpush.bf16.msrb.mxu3 %v1507_v7  ;;  %v1349_v7 = vor.u32 %v1515_v5, %v1348_v4 }
  0x53   :  { %720 = vmatpush.bf16.msrb.mxu0 %v1482_v8  ;;  %v1350_v8 = vld [vmem:[#allocation7 + $0x8] sm:$0xf0] }
  0x54   :  { %734 = vmatpush.bf16.msrb.mxu1 %v1490_v9  ;;  %v1550_v9 = vld [vmem:[%s1805_s2] ss:$0 sm:$0xff] }
  0x55   :  { %748 = vmatpush.bf16.msrb.mxu2 %v1498_v10  ;;  %v1353_v10 = vor.u32 %v1514_v6, %v1350_v8 }
  0x56   :  { %762 = vmatpush.bf16.msrb.mxu3 %v1506_v11  ;;  %721 = vmatmul.bf16.vlgmr.msrb.gmra.mxu0 %v1077_v20  ;;  %v1535_v20 = vld [vmem:[#allocation8 + $0x28] sm:$0xff] }
  0x57   :  { %735 = vmatmul.bf16.vlgmr.msrb.gmra.mxu1 %v1081_v21  ;;  %874 = vmatpush.bf16.msra.mxu0 %v1405_v27 }
  0x58   :  { %749 = vmatmul.bf16.vlgmr.msrb.gmra.mxu2 %v1085_v22  ;;  %888 = vmatpush.bf16.msra.mxu1 %v1409_v31 }
  0x59   :  { %763 = vmatmul.bf16.vlgmr.msrb.gmra.mxu3 %v1089_v23  ;;  %975 = vmatpush.bf16.msra.mxu2 %v1537_v15 }
  0x5b   :  { %875 = vmatpush.bf16.msra.mxu0 %v1397_v34 }
  0x5c   :  { %889 = vmatpush.bf16.msra.mxu1 %v1401_v35 }
  0x5d   :  { %976 = vmatpush.bf16.msra.mxu2 %v1536_v16 }
  0x5f   :  { %876 = vmatpush.bf16.msra.mxu0 %v1389_v39 }
  0x60   :  { %890 = vmatpush.bf16.msra.mxu1 %v1393_v41 }
  0x61   :  { %977 = vmatpush.bf16.msra.mxu2 %v1535_v20 }
  0x63   :  { %877 = vmatpush.bf16.msra.mxu0 %v1381_v45 }
  0x64   :  { %891 = vmatpush.bf16.msra.mxu1 %v1385_v47 }
  0x65   :  { %978 = vmatpush.bf16.msra.mxu2 %v1534_v26 }
  0x67   :  { %878 = vmatpush.bf16.msra.mxu0 %v1373_v51  ;;  %v1530_v51 = vld [vmem:[#allocation8] sm:$0xff] }
  0x68   :  { %892 = vmatpush.bf16.msra.mxu1 %v1377_v53  ;;  %v790_v53 = vperm.slane %v788_v52, 0 }
  0x69   :  { %979 = vmatpush.bf16.msra.mxu2 %v1533_v48 }
  0x6b   :  { %879 = vmatpush.bf16.msra.mxu0 %v1365_v57  ;;  %v791_v57 = vperm.slane %v788_v52, 1 }
  0x6c   :  { %893 = vmatpush.bf16.msra.mxu1 %v1369_v59 }
  0x6d   :  { %980 = vmatpush.bf16.msra.mxu2 %v1532_v49 }
  0x6f   :  { %880 = vmatpush.bf16.msra.mxu0 %v1357_v0 }
  0x70   :  { %894 = vmatpush.bf16.msra.mxu1 %v1361_v2  ;;  %v1551_v2 = vld [vmem:[%s1809_s6] ss:$0 sm:$0xff]  ;;  %s1721_s6 = smov [#allocation11]  }
  0x71   :  { %981 = vmatpush.bf16.msra.mxu2 %v1531_v50  ;;  %s1036_s7 = sshll.u32 %s1721_s6, 4  ;;  %s1037_s7 = int_to_ptr.vmem [resolvable:$true] %s1036_s7 }
  0x73   :  { %881 = vmatpush.bf16.msra.mxu0 %v1349_v7 }
  0x74   :  { %895 = vmatpush.bf16.msra.mxu1 %v1353_v10 }
  0x75   :  { %982 = vmatpush.bf16.msra.mxu2 %v1530_v51 }
  0xb3   :  { %v666_v60 = vpop.f32.mrf.mxu0 }
  0xb4   :  { %v680_v3 = vpop.f32.mrf.mxu1  ;;  %v667_v13 = vadd.f32 %v1550_v9, %v666_v60 }
  0xb6   :  { %v681_v18 = vadd.f32 %v680_v3, %v667_v13 }
  0xbb   :  { %v694_v11 = vpop.f32.mrf.mxu2  ;;  %v668_v14 = vpop.f32.mrf.mxu0 }
  0xbc   :  { %v708_v12 = vpop.f32.mrf.mxu3  ;;  %v682_v17 = vpop.f32.mrf.mxu1  ;;  %v669_v19 = vadd.f32 %v1550_v9, %v668_v14  ;;  %v695_v23 = vadd.f32 %v694_v11, %v681_v18 }
  0xbe   :  { %v683_v24 = vadd.f32 %v682_v17, %v669_v19  ;;  %v709_v28 = vadd.f32 %v708_v12, %v695_v23 }
  0xc3   :  { %v696_v21 = vpop.f32.mrf.mxu2 }
  0xc4   :  { %v710_v22 = vpop.f32.mrf.mxu3  ;;  %v697_v29 = vadd.f32 %v696_v21, %v683_v24 }
  0xc6   :  { %v711_v33 = vadd.f32 %v710_v22, %v697_v29 }
  0xd3   :  { %v722_v25 = vpop.f32.mrf.mxu0 }
  0xd4   :  { %v736_v27 = vpop.f32.mrf.mxu1  ;;  %v723_v30 = vadd.f32 %v722_v25, %v709_v28 }
  0xd6   :  { %v737_v35 = vadd.f32 %v736_v27, %v723_v30 }
  0xdb   :  { %v750_v31 = vpop.f32.mrf.mxu2  ;;  %v724_v34 = vpop.f32.mrf.mxu0 }
  0xdc   :  { %v764_v32 = vpop.f32.mrf.mxu3  ;;  %v725_v36 = vadd.f32 %v724_v34, %v711_v33  ;;  %v751_v37 = vadd.f32 %v750_v31, %v737_v35  ;;  %v738_v38 = vpop.f32.mrf.mxu1 }
  0xde   :  { %v739_v39 = vadd.f32 %v738_v38, %v725_v36  ;;  %v765_v41 = vadd.f32 %v764_v32, %v751_v37 }
  0xe0   :  { %v769_v45 = vmax.f32 %v765_v41, 0.0 }
  0xe3   :  { %v752_v40 = vpop.f32.mrf.mxu2 }
  0xe4   :  { %v753_v42 = vadd.f32 %v752_v40, %v739_v39  ;;  %v766_v43 = vpop.f32.mrf.mxu3 }
  0xe6   :  { %v767_v44 = vadd.f32 %v766_v43, %v753_v42 }
  0xe8   :  { %v770_v46 = vmax.f32 %v767_v44, 0.0 }
  0xea   :  { %v771_v47 = vpack.c.bf16 %v770_v46, %v769_v45 }
  0xec   :  { %882 = vmatmul.bf16.vlgmr.msra.gmra.mxu0 %v771_v47  ;;  %896 = vmatmul.bf16.vlgmr.msra.gmra.mxu1 %v771_v47 }
 0x169   :  { %v883_v54 = vpop.f32.mrf.mxu0  ;;  %v897_v55 = vpop.f32.mrf.mxu1 }
 0x16a   :  { %v884_v56 = vadd.f32 %v883_v54, %v790_v53  ;;  %v898_v58 = vadd.f32 %v897_v55, %v791_v57 }
 0x16c   :  { %902 = vst [vmem:[#allocation10] sm:$0xff] %v884_v56  ;;  %v904_v63 = vmax.f32 %v898_v58, 0.0 }
 0x171   :  { %v885_v59 = vpop.f32.mrf.mxu0  ;;  %v899_v60 = vpop.f32.mrf.mxu1 }
 0x172   :  { %v886_v61 = vadd.f32 %v885_v59, %v790_v53  ;;  %v900_v62 = vadd.f32 %v899_v60, %v791_v57 }
 0x174   :  { %903 = vst [vmem:[#allocation10 + $0x8] sm:$0xff] %v886_v61  ;;  %v905_v0 = vmax.f32 %v900_v62, 0.0 }
 0x175   :  { %1031 = dma.vmem_to_hbm [thread:$0]  %s1024_s10, 256, %s1026_s13, [#allocation4], %s1717_s25, %s1717_s25, %s1718_s26  }
 0x176   :  { %v906_v1 = vpack.c.bf16 %v905_v0, %v904_v63 }
 0x178   :  { %983 = vmatmul.bf16.vlgmr.msra.gmra.mxu2 %v906_v1 }
 0x1fb   :  { %v984_v3 = vpop.f32.mrf.mxu2 }
 0x1fc   :  { %v985_v4 = vadd.f32 %v1551_v2, %v984_v3 }
 0x1fe   :  { %v989_v5 = vmul.f32 %v985_v4, %v985_v4 }
 0x200   :  { %991 = vadd.xlane.f32.xlu0 %v989_v5 }
 0x203   :  { %v986_v6 = vpop.f32.mrf.mxu2 }
 0x204   :  { %v987_v7 = vadd.f32 %v1551_v2, %v986_v6 }
 0x206   :  { %v990_v8 = vmul.f32 %v987_v7, %v987_v7 }
 0x208   :  { %993 = vadd.xlane.f32.xlu0 %v990_v8 }
 0x273   :  { %v992_v9 = vpop.xlane.xlu0 %991 }
 0x274   :  { %1552 = vrsqrt.f32 %v992_v9  ;;  %vm1001_vm1 = vweird.f32 %v992_v9 }
 0x27a   :  { %v1553_v10 = vpop.eup %1552 }
 0x27b   :  { %v996_v11 = vmul.f32 %v1553_v10, %v992_v9  ;;  %v994_v12 = vpop.xlane.xlu0 %993  ;;  %vm1002_vm0 = vweird.f32 %v1553_v10 }
 0x27c   :  { %1554 = vrsqrt.f32 %v994_v12  ;;  %vm1003_vm2 = vmor %vm1001_vm1, %vm1002_vm0  ;;  %vm1011_vm4 = vweird.f32 %v994_v12 }
 0x27d   :  { %v997_v13 = vmul.f32 %v1553_v10, %v996_v11 }
 0x27f   :  { %v998_v14 = vmul.f32 0.5, %v997_v13 }
 0x281   :  { %v999_v15 = vsub.f32 1.5, %v998_v14 }
 0x282   :  { %v1555_v16 = vpop.eup %1554 }
 0x283   :  { %v1000_v17 = vmul.f32 %v1553_v10, %v999_v15  ;;  %v1006_v18 = vmul.f32 %v1555_v16, %v994_v12  ;;  %vm1012_vm3 = vweird.f32 %v1555_v16 }
 0x284   :  { %vm1013_vm5 = vmor %vm1011_vm4, %vm1012_vm3 }
 0x285   :  { %v1004_v19 = vsel %vm1003_vm2, %v1553_v10, %v1000_v17  ;;  %v1007_v20 = vmul.f32 %v1555_v16, %v1006_v18 }
 0x286   :  { %v1015_v21 = vmul.f32 %v1004_v19, %v985_v4 }
 0x287   :  { %v1008_v22 = vmul.f32 0.5, %v1007_v20 }
 0x288   :  { %1017 = vst [vmem:[#allocation11] sm:$0xff] %v1015_v21 }
 0x289   :  { %v1009_v23 = vsub.f32 1.5, %v1008_v22 }
 0x28b   :  { %v1010_v24 = vmul.f32 %v1555_v16, %v1009_v23 }
 0x28d   :  { %v1014_v25 = vsel %vm1013_vm5, %v1555_v16, %v1010_v24 }
 0x28e   :  { %v1016_v26 = vmul.f32 %v1014_v25, %v987_v7 }
 0x290   :  { %1018 = vst [vmem:[#allocation11 + $0x8] sm:$0xff] %v1016_v26 }
 0x291   :  { %1044 = dma.vmem_to_hbm [thread:$0]  %s1037_s7, 256, %s1039_s16, [#allocation12], %s1717_s25, %s1717_s25, %s1718_s26  }
 0x292   :  { %1706 = dma.done.wait [#allocation4], 256  }
 0x293   :  { %1707 = vsyncadd [#allocation4], 4294967040 }
 0x294   :  { %1708 = dma.done.wait [#allocation12], 256  }
 0x295   :  { %1709 = vsyncadd [#allocation12], 4294967040 }
 0x296   :  { %1053 = vsyncpa [#allocation3], 1 }
 0x297   :  { %1054 = vsyncpa [#allocation6], 1 }
 0x298   :  { %1055 = vsyncpa [#allocation9], 1 }
 0x299   :  { %1056 = vsyncpa [#allocation4], 1 }
 0x29a   :  { %1057 = vsyncpa [#allocation12], 1 }

</bundles_post_ra>
